<compile_context>
chip_gen: v7x
topology: tpu7x:2x2x1
jax: 0.10.0
libtpu: 0.0.40
codegen_flags: <defaults>
</compile_context>

<pallas_src>
import functools

import jax
import jax.numpy as jnp
from jax import lax
from jax.experimental import pallas as pl
from jax.experimental.pallas import tpu as pltpu

LN_EPS = 1e-5


def _round_up(x, m):
    return ((x + m - 1) // m) * m


def _vmem_capacity_bytes():
    """Physical VMEM of the local TPU generation (fallback: v7x-safe 64 MiB)."""
    try:
        cap = int(pltpu.get_tpu_info().vmem_capacity_bytes)
        if cap > 0:
            return cap
    except Exception:
        pass
    return 64 * 1024 * 1024


def _is_dual_tensorcore_part():
    """True on v7x-class chips (two TensorCores share the 'parallel' grid axis)."""
    try:
        return "v7" in jax.devices()[0].device_kind.lower()
    except Exception:
        return False


def _seg_merge_kernel(x_ref, w_ref, e_ref, p_ref, b_ref, o_ref, *, inv_k, groups):
    """Fused LayerNorm + Linear on (t, groups*K) merged-segment rows.

    The LN affine and mean subtraction live in w_ref (centered, gamma-scaled,
    block-diagonal), so only the per-chunk rstd correction is applied after the
    MXU matmul:  out[:, r*D:(r+1)*D] = rstd_r * (x_chunk_r @ W'') + b'.
    """
    x = x_ref[...]
    xf = x.astype(jnp.float32)

    # One-pass LayerNorm statistics per merged segment of length K = 1/inv_k.
    if groups == 1:
        s1 = jnp.sum(xf, axis=-1, keepdims=True)
        s2 = jnp.sum(xf * xf, axis=-1, keepdims=True)
    else:
        # Lane-segmented sums via a tiny 0/1 matmul (no in-kernel relayout).
        e = e_ref[...]
        s1 = jnp.dot(xf, e, preferred_element_type=jnp.float32)
        s2 = jnp.dot(xf * xf, e, preferred_element_type=jnp.float32)
    mean = s1 * inv_k
    var = jnp.maximum(s2 * inv_k - mean * mean, 0.0)
    rstd = lax.rsqrt(var + LN_EPS)                                   # (t, groups)

    # Projection straight from the storage dtype (bf16-native MXU), f32 accumulate.
    acc = jnp.dot(x.astype(w_ref.dtype), w_ref[...],
                  preferred_element_type=jnp.float32)                # (t, groups*D)

    if groups == 1:
        out = rstd * acc + b_ref[...]
    else:
        # Broadcast each chunk's rstd to its D output lanes with a tiny matmul.
        rstd_l = jnp.dot(rstd, p_ref[...], preferred_element_type=jnp.float32)
        out = rstd_l * acc + b_ref[...]
    o_ref[...] = out.astype(o_ref.dtype)


def seg_merging_forward(x, gamma, beta, weight, bias, win_size, *,
                        tm=1024, matmul_in_bf16=False):
    """SegMerging forward.

    x:      (B, ts_d, seg_num, d_model)
    gamma/beta: (win_size * d_model,)       LayerNorm affine
    weight: (d_model, win_size * d_model)   torch nn.Linear layout (out, in)
    bias:   (d_model,)
    tm:     target kernel block rows (after output packing); shrunk to fit VMEM.
    matmul_in_bf16: optionally run the projection in bf16 for f32 inputs
                    (v5e MXU speedup; LN statistics stay f32).
    """
    B, ts_d, seg_num, d_model = x.shape
    D = d_model
    K = win_size * d_model
    itemsize = jnp.dtype(x.dtype).itemsize
    f32 = jnp.float32

    # --- segment merge: pad tail only if needed, then a pure row-major reshape -
    if seg_num % win_size != 0:
        pad_num = win_size - seg_num % win_size
        x = jnp.concatenate([x, x[:, :, -pad_num:, :]], axis=-2)
    seg2 = x.shape[2] // win_size
    rows = B * ts_d * seg2

    # --- lane-dense output packing for narrow d_model ---------------------------
    g = 1
    if D < 128 and 128 % D == 0 and rows % (128 // D) == 0:
        g = 128 // D
    R, G, O = rows // g, g * K, g * D
    x_flat = x.reshape(R, G)                         # free (row-major) reshape

    # --- fold LayerNorm affine + mean subtraction into the projection ----------
    w_t = weight.T.astype(f32)                                   # (K, D)
    wp = gamma.astype(f32)[:, None] * w_t                        # gamma-folded
    wpc = wp - jnp.mean(wp, axis=0, keepdims=True)               # mean-centered
    bp = beta.astype(f32)[None, :] @ w_t + bias.astype(f32)[None, :]   # (1, D)

    mm_dtype = (jnp.bfloat16 if (matmul_in_bf16 and x.dtype == jnp.float32)
                else x.dtype)
    mm_itemsize = jnp.dtype(mm_dtype).itemsize
    eye_g = jnp.eye(g, dtype=f32)
    w_big = jnp.kron(eye_g, wpc).astype(mm_dtype)                # (G, O) block-diag
    e_big = jnp.kron(eye_g, jnp.ones((K, 1), f32))               # (G, g) chunk sums
    p_big = jnp.kron(eye_g, jnp.ones((1, D), f32))               # (g, O) rstd bcast
    b_big = jnp.tile(bp, (1, g))                                 # (1, O)

    # --- tile selection & VMEM policy (generation aware) -----------------------
    sub = max(8, 32 // itemsize)          # sublane packing: 8 f32 / 16 bf16 / 32 i8
    cap = _vmem_capacity_bytes()
    budget = (cap * 3) // 4               # headroom for compiler scratch / spill

    def tiles_bytes(t):
        io = 2 * t * (G + O) * itemsize                         # dbl-buffered streams
        consts = 2 * (G * O * mm_itemsize + (G * g + g * O + O) * 4)
        temps = 2 * t * G * 4 + 3 * t * O * 4 + 4 * t * g * 4   # f32 x, x*x, acc/out
        return io + consts + temps

    t = max(sub, min(_round_up(tm, sub), _round_up(R, sub)))
    while t > sub and tiles_bytes(t) > budget:
        t = max(sub, _round_up(t // 2, sub))
    # Only dual-TensorCore parts benefit from forcing an (even) >= 2-step grid;
    # on single-core v5e/v6e it would just add pipeline overhead.
    if _is_dual_tensorcore_part() and pl.cdiv(R, t) == 1 and R >= 2 * sub:
        t = _round_up(pl.cdiv(R, 2), sub)
    if t >= R:
        t = R                              # exact single block (always layout-legal)

    grid = (pl.cdiv(R, t),)
    vmem_limit = int(min(cap - (4 << 20),
                         max(32 << 20, tiles_bytes(t) + (8 << 20))))

    kernel = functools.partial(_seg_merge_kernel, inv_k=1.0 / float(K), groups=g)
    # No HBM-side row padding: a ragged final block (R % t != 0) is handled by
    # Pallas' masked partial block; all math is per-row so garbage rows in the
    # pad region cannot contaminate stored rows.
    out = pl.pallas_call(
        kernel,
        out_shape=jax.ShapeDtypeStruct((R, O), x.dtype),
        grid_spec=pltpu.PrefetchScalarGridSpec(
            num_scalar_prefetch=0,
            grid=grid,
            in_specs=[
                pl.BlockSpec((t, G), lambda i: (i, 0)),   # merged rows (streamed)
                pl.BlockSpec((G, O), lambda i: (0, 0)),   # folded weight (constant)
                pl.BlockSpec((G, g), lambda i: (0, 0)),   # chunk-sum matrix
                pl.BlockSpec((g, O), lambda i: (0, 0)),   # rstd broadcast matrix
                pl.BlockSpec((1, O), lambda i: (0, 0)),   # folded bias
            ],
            out_specs=pl.BlockSpec((t, O), lambda i: (i, 0)),
        ),
        compiler_params=pltpu.CompilerParams(
            dimension_semantics=("parallel",),
            vmem_limit_bytes=vmem_limit),
    )(x_flat, w_big, e_big, p_big, b_big)

    return out.reshape(B, ts_d, seg2, D)


def _reference(x, gamma, beta, weight, bias, win_size):
    B, ts_d, seg_num, d_model = x.shape
    pad_num = seg_num % win_size
    if pad_num != 0:
        pad_num = win_size - pad_num
        x = jnp.concatenate([x, x[:, :, -pad_num:, :]], axis=-2)
    segs = [x[:, :, i::win_size, :] for i in range(win_size)]
    xm = jnp.concatenate(segs, axis=-1).astype(jnp.float32)
    mean = jnp.mean(xm, axis=-1, keepdims=True)
    var = jnp.mean((xm - mean) ** 2, axis=-1, keepdims=True)
    xn = (xm - mean) / jnp.sqrt(var + LN_EPS)
    y = xn * gamma + beta
    return (y @ weight.T.astype(jnp.float32) + bias).astype(x.dtype)


if __name__ == "__main__":
    key = jax.random.PRNGKey(0)
    kx, kw, kb, kx2, kw2, kb2 = jax.random.split(key, 6)

    # Config A: d_model < 128 -> lane-dense packed-output path (g = 4).
    B, ts_d, seg_num, d_model, win_size = 2, 4, 8, 32, 2
    K = win_size * d_model
    x = jax.random.normal(kx, (B, ts_d, seg_num, d_model), dtype=jnp.float32)
    gamma = jnp.ones((K,), jnp.float32)
    beta = jnp.zeros((K,), jnp.float32)
    weight = jax.random.normal(kw, (d_model, K), jnp.float32) * 0.02
    bias = jax.random.normal(kb, (d_model,), jnp.float32) * 0.02

    out = jax.block_until_ready(
        seg_merging_forward(x, gamma, beta, weight, bias, win_size))
    ref = _reference(x, gamma, beta, weight, bias, win_size)
    assert out.shape == (B, ts_d, seg_num // win_size, d_model)
    assert jnp.allclose(out, ref, atol=1e-4, rtol=1e-4), \
        float(jnp.max(jnp.abs(out - ref)))

    # Padding path (seg_num not divisible by win_size).
    x7 = x[:, :, :7, :]
    out7 = jax.block_until_ready(
        seg_merging_forward(x7, gamma, beta, weight, bias, win_size))
    ref7 = _reference(x7, gamma, beta, weight, bias, win_size)
    assert out7.shape == ref7.shape
    assert jnp.allclose(out7, ref7, atol=1e-4, rtol=1e-4), \
        float(jnp.max(jnp.abs(out7 - ref7)))

    # bf16 storage dtype (bf16 MXU path, f32 statistics / accumulation).
    xb = x.astype(jnp.bfloat16)
    outb = jax.block_until_ready(
        seg_merging_forward(xb, gamma, beta, weight, bias, win_size))
    refb = _reference(xb.astype(jnp.float32), gamma, beta,
                      weight.astype(jnp.bfloat16).astype(jnp.float32),
                      bias, win_size)
    assert jnp.allclose(outb.astype(jnp.float32), refb, atol=3e-2, rtol=3e-2), \
        float(jnp.max(jnp.abs(outb.astype(jnp.float32) - refb)))

    # Config B: d_model >= 128 -> plain (unpacked) path, g = 1.
    B2, ts2, sn2, d2, win2 = 2, 2, 4, 128, 2
    K2 = win2 * d2
    x2 = jax.random.normal(kx2, (B2, ts2, sn2, d2), dtype=jnp.float32)
    gamma2 = jnp.ones((K2,), jnp.float32)
    beta2 = jnp.zeros((K2,), jnp.float32)
    weight2 = jax.random.normal(kw2, (d2, K2), jnp.float32) * 0.02
    bias2 = jax.random.normal(kb2, (d2,), jnp.float32) * 0.02
    out2 = jax.block_until_ready(
        seg_merging_forward(x2, gamma2, beta2, weight2, bias2, win2))
    ref2 = _reference(x2, gamma2, beta2, weight2, bias2, win2)
    assert out2.shape == (B2, ts2, sn2 // win2, d2)
    assert jnp.allclose(out2, ref2, atol=1e-4, rtol=1e-4), \
        float(jnp.max(jnp.abs(out2 - ref2)))

    print("KERNEL_OK")
</pallas_src>

<mosaic_0001>
module attributes {stable_mosaic.version = 11 : i64} {
  func.func @_seg_merge_kernel(%arg0: i32, %arg1: memref<8x256xf32, #tpu.memory_space<vmem>>, %arg2: memref<256x128xf32, #tpu.memory_space<vmem>>, %arg3: memref<256x4xf32, #tpu.memory_space<vmem>>, %arg4: memref<4x128xf32, #tpu.memory_space<vmem>>, %arg5: memref<1x128xf32, #tpu.memory_space<vmem>>, %arg6: memref<8x128xf32, #tpu.memory_space<vmem>>) attributes {dimension_semantics = [#tpu.dimension_semantics<parallel>], iteration_bounds = array<i64: 1>, scalar_prefetch = 0 : i64, scratch_operands = 0 : i64, tpu.core_type = #tpu.core_type<tc>, window_params = [{transform_indices = @transform_0, window_bounds = array<i64: 8, 256>}, {pipeline_mode = #tpu.pipeline_mode<synchronous>, transform_indices = @transform_1, window_bounds = array<i64: 256, 128>}, {pipeline_mode = #tpu.pipeline_mode<synchronous>, transform_indices = @transform_2, window_bounds = array<i64: 256, 4>}, {pipeline_mode = #tpu.pipeline_mode<synchronous>, transform_indices = @transform_3, window_bounds = array<i64: 4, 128>}, {pipeline_mode = #tpu.pipeline_mode<synchronous>, transform_indices = @transform_4, window_bounds = array<i64: 1, 128>}, {transform_indices = @transform_5, window_bounds = array<i64: 8, 128>}]} {
    %c0 = arith.constant 0 : index
    %c0_0 = arith.constant 0 : index
    %0 = vector.load %arg1[%c0, %c0_0] : memref<8x256xf32, #tpu.memory_space<vmem>>, vector<8x256xf32>
    %c0_1 = arith.constant 0 : index
    %c0_2 = arith.constant 0 : index
    %1 = vector.load %arg3[%c0_1, %c0_2] : memref<256x4xf32, #tpu.memory_space<vmem>>, vector<256x4xf32>
    %cst = arith.constant dense<0.000000e+00> : vector<8x4xf32>
    %2 = tpu.matmul %0, %1, %cst {dimension_numbers = #tpu.dot_dimension_numbers<[1], [0], [0], [1], [0, 0, 1, 1], [], []>} : vector<8x256xf32>, vector<256x4xf32>, vector<8x4xf32> -> vector<8x4xf32>
    %3 = arith.mulf %0, %0 : vector<8x256xf32>
    %cst_3 = arith.constant dense<0.000000e+00> : vector<8x4xf32>
    %4 = tpu.matmul %3, %1, %cst_3 {dimension_numbers = #tpu.dot_dimension_numbers<[1], [0], [0], [1], [0, 0, 1, 1], [], []>} : vector<8x256xf32>, vector<256x4xf32>, vector<8x4xf32> -> vector<8x4xf32>
    %cst_4 = arith.constant 1.562500e-02 : f32
    %5 = vector.broadcast %cst_4 : f32 to vector<8x4xf32>
    %6 = arith.mulf %2, %5 : vector<8x4xf32>
    %cst_5 = arith.constant 1.562500e-02 : f32
    %7 = vector.broadcast %cst_5 : f32 to vector<8x4xf32>
    %8 = arith.mulf %4, %7 : vector<8x4xf32>
    %9 = arith.mulf %6, %6 : vector<8x4xf32>
    %10 = arith.subf %8, %9 : vector<8x4xf32>
    %cst_6 = arith.constant 0.000000e+00 : f32
    %11 = vector.broadcast %cst_6 : f32 to vector<8x4xf32>
    %12 = arith.maximumf %10, %11 : vector<8x4xf32>
    %cst_7 = arith.constant 9.99999974E-6 : f32
    %13 = vector.broadcast %cst_7 : f32 to vector<8x4xf32>
    %14 = arith.addf %12, %13 : vector<8x4xf32>
    %15 = math.rsqrt %14 : vector<8x4xf32>
    %c0_8 = arith.constant 0 : index
    %c0_9 = arith.constant 0 : index
    %16 = vector.load %arg2[%c0_8, %c0_9] : memref<256x128xf32, #tpu.memory_space<vmem>>, vector<256x128xf32>
    %cst_10 = arith.constant dense<0.000000e+00> : vector<8x128xf32>
    %17 = tpu.matmul %0, %16, %cst_10 {dimension_numbers = #tpu.dot_dimension_numbers<[1], [0], [0], [1], [0, 0, 1, 1], [], []>} : vector<8x256xf32>, vector<256x128xf32>, vector<8x128xf32> -> vector<8x128xf32>
    %c0_11 = arith.constant 0 : index
    %c0_12 = arith.constant 0 : index
    %18 = vector.load %arg4[%c0_11, %c0_12] : memref<4x128xf32, #tpu.memory_space<vmem>>, vector<4x128xf32>
    %cst_13 = arith.constant dense<0.000000e+00> : vector<8x128xf32>
    %19 = tpu.matmul %15, %18, %cst_13 {dimension_numbers = #tpu.dot_dimension_numbers<[1], [0], [0], [1], [0, 0, 1, 1], [], []>} : vector<8x4xf32>, vector<4x128xf32>, vector<8x128xf32> -> vector<8x128xf32>
    %20 = arith.mulf %19, %17 : vector<8x128xf32>
    %c0_14 = arith.constant 0 : index
    %c0_15 = arith.constant 0 : index
    %21 = vector.load %arg5[%c0_14, %c0_15] : memref<1x128xf32, #tpu.memory_space<vmem>>, vector<1x128xf32>
    %22 = vector.broadcast %21 : vector<1x128xf32> to vector<8x128xf32>
    %23 = arith.addf %20, %22 : vector<8x128xf32>
    %c0_16 = arith.constant 0 : index
    %c0_17 = arith.constant 0 : index
    %24 = vector.load %arg6[%c0_16, %c0_17] : memref<8x128xf32, #tpu.memory_space<vmem>>, vector<8x128xf32>
    tpu.vector_store %arg6[%c0_16, %c0_17], %23 {strides = array<i32>} : memref<8x128xf32, #tpu.memory_space<vmem>>, vector<8x128xf32>,
    return
  }
  func.func @transform_0(%arg0: i32) -> (i32, i32) {
    %c0_i32 = arith.constant 0 : i32
    %c0_i32_0 = arith.constant 0 : i32
    return %arg0, %c0_i32 : i32, i32
  }
  func.func @transform_1(%arg0: i32) -> (i32, i32) {
    %c0_i32 = arith.constant 0 : i32
    %c0_i32_0 = arith.constant 0 : i32
    %c0_i32_1 = arith.constant 0 : i32
    return %c0_i32, %c0_i32_0 : i32, i32
  }
  func.func @transform_2(%arg0: i32) -> (i32, i32) {
    %c0_i32 = arith.constant 0 : i32
    %c0_i32_0 = arith.constant 0 : i32
    %c0_i32_1 = arith.constant 0 : i32
    return %c0_i32, %c0_i32_0 : i32, i32
  }
  func.func @transform_3(%arg0: i32) -> (i32, i32) {
    %c0_i32 = arith.constant 0 : i32
    %c0_i32_0 = arith.constant 0 : i32
    %c0_i32_1 = arith.constant 0 : i32
    return %c0_i32, %c0_i32_0 : i32, i32
  }
  func.func @transform_4(%arg0: i32) -> (i32, i32) {
    %c0_i32 = arith.constant 0 : i32
    %c0_i32_0 = arith.constant 0 : i32
    %c0_i32_1 = arith.constant 0 : i32
    return %c0_i32, %c0_i32_0 : i32, i32
  }
  func.func @transform_5(%arg0: i32) -> (i32, i32) {
    %c0_i32 = arith.constant 0 : i32
    %c0_i32_0 = arith.constant 0 : i32
    return %arg0, %c0_i32 : i32, i32
  }
}

</mosaic_0001>

<bundles_post_ra>
// kernel: tpu_custom_call.1
= control target key start
LH: loop header
LB: loop body
LE: loop exit
PB: predicated region body
PF: predicated region fallthrough
CT: control target
= control target key end

     0   :  { %10 = vsyncpa [#allocation3], 0  ;;  %s955_s0 = inlined_call_operand.hbm [shape: f32[8,256], index: 0, kind: input, shape index: {}]   ;;  %s956_s1 = inlined_call_operand.vmem [shape: f32[256,128], index: 1, kind: input, shape index: {}]   ;;  %s957_s2 = inlined_call_operand.vmem [shape: f32[256,4], index: 2, kind: input, shape index: {}]   ;;  %s958_s3 = inlined_call_operand.vmem [shape: f32[4,128], index: 3, kind: input, shape index: {}]   ;;  %s959_s4 = inlined_call_operand.vmem [shape: f32[1,128], index: 4, kind: input, shape index: {}]   ;;  %s960_s5 = inlined_call_operand.hbm [shape: f32[8,128], index: 5, kind: output, shape index: {}]  }
   0x1   :  { %11 = vsyncpa [#allocation4], 0  ;;  %s687_s18 = smov [#allocation2]   ;;  %s639_s22 = scalar_lea.hbm %s955_s0, 256 }
   0x2   :  { %s18_s19 = sshll.u32 %s687_s18, 4  ;;  %p640_p0 = scmp.ne.s32.totalorder %s955_s0, %s639_s22  ;;  %s19_s19 = int_to_ptr.vmem [resolvable:$true] %s18_s19 }
   0x3   :  { %p643_p1 = scmp.lt.u32.totalorder %s639_s22, %s955_s0 }
   0x5   :  { %p645_p2 = pnand %p643_p1, %p640_p0 }
   0x7   :  { %648 = shalt.err (!%p645_p2)
}
   0x8   :  { %s649_s27 = scalar_lea.vmem %s19_s19, 256  ;;  %p654_p4 = scmp.lt.s32.totalorder %s19_s19, %s19_s19 }
   0x9   :  { %p650_p3 = scmp.ne.s32.totalorder %s19_s19, %s649_s27  ;;  %p655_p5 = scmp.lt.s32.totalorder %s649_s27, %s649_s27 }
   0xb   :  { %p656_p6 = por %p655_p5, %p654_p4 }
   0xd   :  { %p657_p7 = pnand %p656_p6, %p650_p3 }
   0xf   :  { %660 = shalt.err (!%p657_p7)
}
  0x10   :  { %21 = dma.hbm_to_vmem [thread:$0]  %s955_s0, 256, %s19_s19, [#allocation3]  }
  0x11   :  { %683 = dma.done.wait [#allocation3], 256  }
  0x12   :  { %684 = vsyncadd [#allocation3], 4294967040  ;;  %v51_v0 = vld [vmem:[%s957_s2 + $0x80] sm:$0xff]  ;;  %v52_v1 = vld [vmem:[%s957_s2 + $0x88] sm:$0xff]  ;;  %vm323_vm0 = vcmask 1043456   ;;  %vm689_vm1 = vmmov 0  }
  0x13   :  { %v35_v2 = vld [vmem:[%s957_s2] sm:$0xff]  ;;  %v537_v3 = vpack.c.bf16 %v52_v1, %v51_v0  ;;  %v36_v4 = vld [vmem:[%s957_s2 + $0x8] sm:$0xff]  ;;  %v53_v5 = vld [vmem:[%s957_s2 + $0x90] sm:$0xff]  ;;  %vm319_vm2 = vcmask 31744   ;;  %s690_s27 = smov [#allocation5]  }
  0x14   :  { %v54_v6 = vld [vmem:[%s957_s2 + $0x98] sm:$0xff]  ;;  %v539_v7 = vpack.c.bf16 %v36_v4, %v35_v2  ;;  %v37_v9 = vld [vmem:[%s957_s2 + $0x10] sm:$0xff]  ;;  %v55_v11 = vld [vmem:[%s957_s2 + $0xa0] sm:$0xff]  ;;  %s413_s28 = sshll.u32 %s690_s27, 4  ;;  %s414_s28 = int_to_ptr.vmem [resolvable:$true] %s413_s28 }
  0x15   :  { %v541_v8 = vpack.c.bf16 %v54_v6, %v53_v5  ;;  %v38_v10 = vld [vmem:[%s957_s2 + $0x18] sm:$0xff]  ;;  %538 = vmatprep.subr.bf16.mxu0 %v537_v3  ;;  %570 = vmatprep.subr.bf16.mxu1 %v537_v3  ;;  %v56_v12 = vld [vmem:[%s957_s2 + $0xa8] sm:$0xff]  ;;  %v39_v15 = vld [vmem:[%s957_s2 + $0x20] sm:$0xff]  ;;  %s661_s29 = scalar_lea.vmem %s414_s28, 128  ;;  %p666_p9 = scmp.lt.s32.totalorder %s414_s28, %s414_s28 }
  0x16   :  { %540 = vmatpush3.bf16.msra.mxu0 %v539_v7  ;;  %572 = vmatpush3.bf16.msra.mxu1 %v539_v7  ;;  %v543_v13 = vpack.c.bf16 %v38_v10, %v37_v9  ;;  %v545_v14 = vpack.c.bf16 %v56_v12, %v55_v11  ;;  %v40_v16 = vld [vmem:[%s957_s2 + $0x28] sm:$0xff]  ;;  %v57_v17 = vld [vmem:[%s957_s2 + $0xb0] sm:$0xff]  ;;  %v58_v18 = vld [vmem:[%s957_s2 + $0xb8] sm:$0xff]  ;;  %p662_p8 = scmp.ne.s32.totalorder %s414_s28, %s661_s29  ;;  %p667_p10 = scmp.lt.s32.totalorder %s661_s29, %s661_s29 }
  0x17   :  { %542 = vmatprep.subr.bf16.mxu0 %v541_v8  ;;  %574 = vmatprep.subr.bf16.mxu1 %v541_v8  ;;  %v547_v19 = vpack.c.bf16 %v40_v16, %v39_v15  ;;  %v549_v20 = vpack.c.bf16 %v58_v18, %v57_v17  ;;  %v41_v21 = vld [vmem:[%s957_s2 + $0x30] sm:$0xff]  ;;  %v42_v22 = vld [vmem:[%s957_s2 + $0x38] sm:$0xff]  ;;  %v59_v23 = vld [vmem:[%s957_s2 + $0xc0] sm:$0xff] }
  0x18   :  { %v60_v24 = vld [vmem:[%s957_s2 + $0xc8] sm:$0xff]  ;;  %v551_v27 = vpack.c.bf16 %v42_v22, %v41_v21  ;;  %v43_v29 = vld [vmem:[%s957_s2 + $0x40] sm:$0xff]  ;;  %v61_v31 = vld [vmem:[%s957_s2 + $0xd0] sm:$0xff]  ;;  %p668_p11 = por %p667_p10, %p666_p9 }
  0x19   :  { %v787_v25 = vld [vmem:[#allocation2 + $0x8] sm:$0xff]  ;;  %v553_v28 = vpack.c.bf16 %v60_v24, %v59_v23  ;;  %v62_v32 = vld [vmem:[%s957_s2 + $0xd8] sm:$0xff]  ;;  %v45_v35 = vld [vmem:[%s957_s2 + $0x50] sm:$0xff] }
  0x1a   :  { %544 = vmatpush3.bf16.msra.mxu0 %v543_v13  ;;  %576 = vmatpush3.bf16.msra.mxu1 %v543_v13  ;;  %v138_v26 = vmul.f32 %v787_v25, %v787_v25  ;;  %v44_v30 = vld [vmem:[%s957_s2 + $0x48] sm:$0xff]  ;;  %v557_v34 = vpack.c.bf16 %v62_v32, %v61_v31  ;;  %v46_v36 = vld [vmem:[%s957_s2 + $0x58] sm:$0xff]  ;;  %v63_v37 = vld [vmem:[%s957_s2 + $0xe0] sm:$0xff]  ;;  %p669_p12 = pnand %p668_p11, %p662_p8 }
  0x1b   :  { %546 = vmatprep.subr.bf16.mxu0 %v545_v14  ;;  %578 = vmatprep.subr.bf16.mxu1 %v545_v14  ;;  %v555_v33 = vpack.c.bf16 %v44_v30, %v43_v29  ;;  %v64_v38 = vld [vmem:[%s957_s2 + $0xe8] sm:$0xff]  ;;  %v559_v39 = vpack.c.bf16 %v46_v36, %v45_v35  ;;  %v47_v41 = vld [vmem:[%s957_s2 + $0x60] sm:$0xff]  ;;  %v65_v43 = vld [vmem:[%s957_s2 + $0xf0] sm:$0xff]  ;;  %v688_v35 = vmov 0.0  }
  0x1c   :  { %131 = vmatprep.mubr.f32.mxu0 %v787_v25  ;;  %203 = vmatprep.mubr.f32.mxu1 %v138_v26  ;;  %v561_v40 = vpack.c.bf16 %v64_v38, %v63_v37  ;;  %v48_v42 = vld [vmem:[%s957_s2 + $0x68] sm:$0xff]  ;;  %v66_v44 = vld [vmem:[%s957_s2 + $0xf8] sm:$0xff]  ;;  %v49_v47 = vld [vmem:[%s957_s2 + $0x70] sm:$0xff] }
  0x1d   :  { %v563_v45 = vpack.c.bf16 %v48_v42, %v47_v41  ;;  %v565_v46 = vpack.c.bf16 %v66_v44, %v65_v43  ;;  %v50_v48 = vld [vmem:[%s957_s2 + $0x78] sm:$0xff]  ;;  %v232_v49 = vld [vmem:[%s956_s1 + $0x80] sm:$0xff]  ;;  %v233_v50 = vld [vmem:[%s956_s1 + $0x88] sm:$0xff] }
  0x1e   :  { %548 = vmatpush3.bf16.msra.mxu0 %v547_v19  ;;  %580 = vmatpush3.bf16.msra.mxu1 %v547_v19  ;;  %v567_v51 = vpack.c.bf16 %v50_v48, %v49_v47  ;;  %v840_v52 = vld [vmem:[#allocation2] sm:$0xff]  ;;  %v601_v53 = vpack.c.bf16 %v233_v50, %v232_v49  ;;  %v217_v55 = vld [vmem:[%s956_s1 + $0x8] sm:$0xff]  ;;  %v234_v56 = vld [vmem:[%s956_s1 + $0x90] sm:$0xff] }
  0x1f   :  { %550 = vmatprep.subr.bf16.mxu0 %v549_v20  ;;  %582 = vmatprep.subr.bf16.mxu1 %v549_v20  ;;  %v216_v54 = vld [vmem:[%s956_s1] sm:$0xff]  ;;  %v235_v57 = vld [vmem:[%s956_s1 + $0x98] sm:$0xff]  ;;  %v137_v58 = vmul.f32 %v840_v52, %v840_v52  ;;  %v218_v61 = vld [vmem:[%s956_s1 + $0x10] sm:$0xff] }
  0x20   :  { %v603_v59 = vpack.c.bf16 %v217_v55, %v216_v54  ;;  %v605_v60 = vpack.c.bf16 %v235_v57, %v234_v56  ;;  %v219_v62 = vld [vmem:[%s956_s1 + $0x18] sm:$0xff]  ;;  %v236_v63 = vld [vmem:[%s956_s1 + $0xa0] sm:$0xff]  ;;  %v237_v0 = vld [vmem:[%s956_s1 + $0xa8] sm:$0xff] }
  0x21   :  { %v607_v1 = vpack.c.bf16 %v219_v62, %v218_v61  ;;  %v609_v2 = vpack.c.bf16 %v237_v0, %v236_v63  ;;  %v220_v3 = vld [vmem:[%s956_s1 + $0x20] sm:$0xff]  ;;  %v221_v4 = vld [vmem:[%s956_s1 + $0x28] sm:$0xff]  ;;  %v238_v6 = vld [vmem:[%s956_s1 + $0xb0] sm:$0xff] }
  0x22   :  { %552 = vmatpush3.bf16.msra.mxu0 %v551_v27  ;;  %584 = vmatpush3.bf16.msra.mxu1 %v551_v27  ;;  %v611_v5 = vpack.c.bf16 %v221_v4, %v220_v3  ;;  %v239_v7 = vld [vmem:[%s956_s1 + $0xb8] sm:$0xff]  ;;  %v222_v9 = vld [vmem:[%s956_s1 + $0x30] sm:$0xff]  ;;  %v240_v12 = vld [vmem:[%s956_s1 + $0xc0] sm:$0xff] }
  0x23   :  { %554 = vmatprep.subr.bf16.mxu0 %v553_v28  ;;  %586 = vmatprep.subr.bf16.mxu1 %v553_v28  ;;  %v613_v8 = vpack.c.bf16 %v239_v7, %v238_v6  ;;  %v223_v10 = vld [vmem:[%s956_s1 + $0x38] sm:$0xff]  ;;  %v241_v13 = vld [vmem:[%s956_s1 + $0xc8] sm:$0xff]  ;;  %v224_v15 = vld [vmem:[%s956_s1 + $0x40] sm:$0xff] }
  0x24   :  { %v615_v11 = vpack.c.bf16 %v223_v10, %v222_v9  ;;  %v617_v14 = vpack.c.bf16 %v241_v13, %v240_v12  ;;  %v225_v16 = vld [vmem:[%s956_s1 + $0x48] sm:$0xff]  ;;  %v242_v18 = vld [vmem:[%s956_s1 + $0xd0] sm:$0xff]  ;;  %v243_v19 = vld [vmem:[%s956_s1 + $0xd8] sm:$0xff] }
  0x25   :  { %v619_v17 = vpack.c.bf16 %v225_v16, %v224_v15  ;;  %v621_v20 = vpack.c.bf16 %v243_v19, %v242_v18  ;;  %v226_v21 = vld [vmem:[%s956_s1 + $0x50] sm:$0xff]  ;;  %v227_v22 = vld [vmem:[%s956_s1 + $0x58] sm:$0xff]  ;;  %v244_v24 = vld [vmem:[%s956_s1 + $0xe0] sm:$0xff] }
  0x26   :  { %556 = vmatpush3.bf16.msra.mxu0 %v555_v33  ;;  %588 = vmatpush3.bf16.msra.mxu1 %v555_v33  ;;  %v623_v23 = vpack.c.bf16 %v227_v22, %v226_v21  ;;  %v228_v27 = vld [vmem:[%s956_s1 + $0x60] sm:$0xff]  ;;  %v229_v28 = vld [vmem:[%s956_s1 + $0x68] sm:$0xff]  ;;  %v246_v30 = vld [vmem:[%s956_s1 + $0xf0] sm:$0xff] }
  0x27   :  { %558 = vmatprep.subr.bf16.mxu0 %v557_v34  ;;  %590 = vmatprep.subr.bf16.mxu1 %v557_v34  ;;  %v627_v29 = vpack.c.bf16 %v229_v28, %v228_v27  ;;  %v247_v31 = vld [vmem:[%s956_s1 + $0xf8] sm:$0xff]  ;;  %v230_v32 = vld [vmem:[%s956_s1 + $0x70] sm:$0xff]  ;;  %v318_v36 = vld [vmem:[%s958_s3] sm:$0xf] }
  0x28   :  { %v629_v33 = vpack.c.bf16 %v247_v31, %v246_v30  ;;  %v231_v34 = vld [vmem:[%s956_s1 + $0x78] sm:$0xff]  ;;  %v424_v55 = vld [vmem:[%s959_s4] ss:$0 sm:$0xff] }
  0x29   :  { %v631_v37 = vpack.c.bf16 %v231_v34, %v230_v32 }
  0x2a   :  { %560 = vmatpush3.bf16.msra.mxu0 %v559_v39  ;;  %592 = vmatpush3.bf16.msra.mxu1 %v559_v39 }
  0x2b   :  { %562 = vmatprep.subr.bf16.mxu0 %v561_v40  ;;  %594 = vmatprep.subr.bf16.mxu1 %v561_v40 }
  0x2e   :  { %564 = vmatpush3.bf16.msra.mxu0 %v563_v45  ;;  %596 = vmatpush3.bf16.msra.mxu1 %v563_v45 }
  0x2f   :  { %566 = vmatprep.subr.bf16.mxu0 %v565_v46  ;;  %598 = vmatprep.subr.bf16.mxu1 %v565_v46 }
  0x32   :  { %568 = vmatpush3.bf16.msra.mxu0 %v567_v51  ;;  %600 = vmatpush3.bf16.msra.mxu1 %v567_v51 }
  0x33   :  { %602 = vmatprep.subr.bf16.mxu0 %v601_v53  ;;  %532 = vmatprep.subr.mxu1 %v688_v35 }
  0x35   :  { %132 = vmatmul.mubr.f32.vlgmr.msra.gmra.mrb[0].mxu0 %v840_v52  ;;  %204 = vmatmul.mubr.f32.vlgmr.msra.gmra.mrb[0].mxu1 %v137_v58 }
  0x36   :  { %604 = vmatpush3.bf16.msra.mxu0 %v603_v59  ;;  %312 = vmatprep.mubr.f32.mxu0 %v787_v25  ;;  %v245_v25 = vld [vmem:[%s956_s1 + $0xe8] sm:$0xff] }
  0x37   :  { %606 = vmatprep.subr.bf16.mxu0 %v605_v60  ;;  %v625_v26 = vpack.c.bf16 %v245_v25, %v244_v24  ;;  %534 = vmatprep.mubr.msk.f32.mxu1 %vm689_vm1, %v688_v35 }
  0x38   :  { %533 = vmatpush3.msk.msra.mxu1 %vm323_vm0, %v318_v36 }
  0x3a   :  { %608 = vmatpush3.bf16.msra.mxu0 %v607_v1 }
  0x3b   :  { %610 = vmatprep.subr.bf16.mxu0 %v609_v2 }
  0x3e   :  { %612 = vmatpush3.bf16.msra.mxu0 %v611_v5 }
  0x3f   :  { %614 = vmatprep.subr.bf16.mxu0 %v613_v8 }
  0x42   :  { %616 = vmatpush3.bf16.msra.mxu0 %v615_v11 }
  0x43   :  { %618 = vmatprep.subr.bf16.mxu0 %v617_v14 }
  0x46   :  { %620 = vmatpush3.bf16.msra.mxu0 %v619_v17 }
  0x47   :  { %622 = vmatprep.subr.bf16.mxu0 %v621_v20 }
  0x4a   :  { %624 = vmatpush3.bf16.msra.mxu0 %v623_v23 }
  0x4b   :  { %626 = vmatprep.subr.bf16.mxu0 %v625_v26 }
  0x4e   :  { %628 = vmatpush3.bf16.msra.mxu0 %v627_v29 }
  0x4f   :  { %630 = vmatprep.subr.bf16.mxu0 %v629_v33 }
  0x52   :  { %632 = vmatpush3.bf16.msra.mxu0 %v631_v37 }
  0x55   :  { %313 = vmatmul.mubr.f32.vlgmr.msra.gmra.mrb[2].mxu0 %v840_v52 }
 0x108   :  { %v457_v38 = vpop.f32.mrb[0].mxu0  ;;  %v492_v39 = vpop.f32.mrb[0].mxu1 }
 0x109   :  { %v458_v40 = vpop.f32.mrb[1].mxu0  ;;  %v493_v41 = vpop.f32.mrb[1].mxu1 }
 0x10a   :  { %v459_v42 = vadd.f32 %v458_v40, %v457_v38  ;;  %v494_v43 = vadd.f32 %v493_v41, %v492_v39 }
 0x10c   :  { %v209_v44 = vmul.f32 0.015625, %v459_v42  ;;  %v210_v45 = vmul.f32 0.015625, %v494_v43 }
 0x10e   :  { %v211_v46 = vmul.f32 %v209_v44, %v209_v44 }
 0x110   :  { %v212_v47 = vsub.f32 %v210_v45, %v211_v46 }
 0x112   :  { %v213_v48 = vmax.f32 %v212_v47, 0.0 }
 0x114   :  { %v214_v49 = vadd.f32 1e-05, %v213_v48 }
 0x116   :  { %637 = vrsqrt.f32 %v214_v49 }
 0x120   :  { %v638_v50 = vpop.eup %637 }
 0x121   :  { %535 = vmatmul.mubr.msk.f32.vlgmr.msra.gmra.mrb[2].mxu1 %vm319_vm2, %v638_v50 }
 0x128   :  { %v527_v51 = vpop.f32.mrb[2].mxu0 }
 0x129   :  { %v528_v53 = vpop.f32.mrb[3].mxu0 }
 0x12a   :  { %v529_v54 = vadd.f32 %v528_v53, %v527_v51 }
 0x1f4   :  { %v393_v52 = vpop.f32.mrb[2].mxu1 }
 0x1f5   :  { %v397_v56 = vmul.f32 %v529_v54, %v393_v52  ;;  %v536_v57 = vpop.f32.mrb[3].mxu1 }
 0x1f7   :  { %v405_v58 = vadd.f32 %v424_v55, %v397_v56 }
 0x1f9   :  { %406 = vst [vmem:[#allocation5] sm:$0xff] %v405_v58 }
 0x1fa   :  { %672 = shalt.err (!%p669_p12)
}
 0x1fb   :  { %s673_s7 = scalar_lea.hbm %s960_s5, 128 }
 0x1fc   :  { %p674_p13 = scmp.ne.s32.totalorder %s960_s5, %s673_s7  ;;  %p677_p0 = scmp.lt.u32.totalorder %s673_s7, %s960_s5 }
 0x1fe   :  { %p679_p1 = pnand %p677_p0, %p674_p13 }
 0x200   :  { %682 = shalt.err (!%p679_p1)
}
 0x201   :  { %416 = dma.vmem_to_hbm [thread:$0]  %s414_s28, 128, %s960_s5, [#allocation4]  }
 0x202   :  { %685 = dma.done.wait [#allocation4], 128  }
 0x203   :  { %686 = vsyncadd [#allocation4], 4294967168 }
 0x204   :  { %420 = vsyncpa [#allocation3], 1 }
 0x205   :  { %421 = vsyncpa [#allocation4], 1 }

</bundles_post_ra>
